<compile_context>
chip_gen: v7x
topology: tpu7x:2x2x1
jax: 0.10.0
libtpu: 0.0.40
codegen_flags: <defaults>
</compile_context>

<pallas_src>
import functools

import jax
import jax.numpy as jnp
from jax.experimental import pallas as pl
from jax.experimental.pallas import tpu as pltpu


def _round_up(x, m):
    return ((x + m - 1) // m) * m


def _head_kernel(feat_ref, w_ref, b_ref, out_ref, *, n_exp):
    # feat_ref: [bt, K]  native dtype, K = C*HW (rows contiguous in HBM -> lane-dense DMA)
    # w_ref:    [K, P]   expanded weight with the 1/(H*W) mean-pool scale folded in
    # b_ref:    [1, P]   f32
    # out_ref:  [bt, P]  f32
    #
    # Pooling is fused into the matmul:
    #   sum_k feats[b, k] * w_big[k, p] == mean_pool(features)[b, :] @ W.T[:, p]
    # The [bt, K] @ [K, P] matmul is tiny FLOP-wise; MXU has full slack.
    params = jnp.dot(feat_ref[...], w_ref[...], preferred_element_type=jnp.float32)
    params = params + b_ref[...]                   # bias broadcasts over the batch tile

    # Per-column post-processing with lane masks on the tiny [bt, P] result.
    col = jax.lax.broadcasted_iota(jnp.int32, params.shape, 1)
    eyelid = jnp.clip(params, 0.0, 1.0)            # cols [n_exp, n_exp+2)
    jaw0 = jnp.maximum(params, 0.0)                # col  n_exp+2 (relu)
    jaw12 = jnp.clip(params, -0.2, 0.2)            # cols [n_exp+3, n_exp+5)

    out = params                                   # expression cols untouched
    out = jnp.where((col >= n_exp) & (col < n_exp + 2), eyelid, out)
    out = jnp.where(col == n_exp + 2, jaw0, out)
    out = jnp.where((col >= n_exp + 3) & (col < n_exp + 5), jaw12, out)

    out_ref[...] = out.astype(out_ref.dtype)


def _pick_batch_tile(B, padded_row_bytes, feat_budget_bytes):
    """Largest batch tile (multiple of 8, or all of B for tiny batches) whose
    double-buffered, padding-aware feature tiles fit the VMEM budget, while
    keeping >=2 grid steps so both v7x TensorCores get work and the pipeline
    can prefetch."""
    if B <= 8:
        # Sublane block legality (multiple of 8, or the full dim) forces a single
        # tile at tiny batches; the v7x 2-TC split only kicks in for larger B.
        return B
    by_vmem = feat_budget_bytes // (2 * padded_row_bytes)
    by_vmem = max(8, (by_vmem // 8) * 8)
    by_steps = max(8, _round_up(pl.cdiv(B, 2), 8))   # guarantees >=2 grid steps
    return int(min(by_vmem, by_steps))


def expression_encoder_head(features_nchw, weight, bias, *, n_exp, batch_tile=None):
    """features_nchw: [B, C, H, W] backbone output (NCHW, native dtype, bf16 ok).

    weight: [P, C] (PyTorch nn.Linear layout), bias: [P], with P = n_exp + 5.
    Returns the same dict as ExpressionEncoder.forward.
    """
    B, C, H, W = features_nchw.shape
    P = weight.shape[0]
    HW = H * W
    K = C * HW
    assert P == n_exp + 5 and weight.shape[1] == C

    # Free contiguous reshape: NCHW -> [B, C*HW]; no transpose, no upcast of the
    # big tensor.  Each batch row is one long contiguous, lane-dense DMA.
    feats = features_nchw.reshape(B, K)

    # Expand the weight so the mean-pool fuses into the matmul:
    #   W_big[c*HW + hw, p] = W[p, c] / HW
    w_big = jnp.repeat(weight.T.astype(jnp.float32) / float(HW), HW, axis=0)  # [K, P]
    if feats.dtype == jnp.bfloat16:
        w_big = w_big.astype(jnp.bfloat16)   # homogeneous bf16 matmul, f32 accumulate
    b = bias.reshape(1, P).astype(jnp.float32)

    feat_itemsize = jnp.dtype(feats.dtype).itemsize
    w_itemsize = jnp.dtype(w_big.dtype).itemsize
    K_pad = _round_up(K, 128)          # lane padding of the VMEM tiles
    P_pad = _round_up(P, 128)

    # Generation-aware VMEM ceiling (v7x: 64 MiB physical per TC; v5e/v6e: 128 MiB).
    try:
        vmem_cap = int(pltpu.get_tpu_info().vmem_capacity_bytes)
    except Exception:  # pragma: no cover - fall back to the tightest generation
        vmem_cap = 64 << 20
    vmem_ceiling = min((vmem_cap * 3) // 4, 96 << 20)

    # Resident (non-batch-tiled) footprint; count 2 buffers per input conservatively.
    fixed_bytes = 2 * K_pad * P_pad * w_itemsize + 2 * 8 * P_pad * 4 + (2 << 20)
    feat_budget = max(1 << 20, vmem_ceiling - fixed_bytes)
    padded_row_bytes = K_pad * feat_itemsize

    bt = batch_tile if batch_tile is not None else _pick_batch_tile(
        B, padded_row_bytes, feat_budget)
    grid = (pl.cdiv(B, bt),)
    bt_pad = _round_up(bt, 8)

    # Padding-aware demand; ragged last batch tile computes on padded rows that
    # are dropped on store (benign — do not mask it).
    demand = (2 * bt_pad * padded_row_bytes        # double-buffered feature tiles
              + 2 * bt_pad * P_pad * 4             # output tiles
              + fixed_bytes)                       # resident weight/bias + slack
    vmem_limit = int(max(min(demand, vmem_ceiling), 4 << 20))

    kernel = functools.partial(_head_kernel, n_exp=n_exp)

    params = pl.pallas_call(
        kernel,
        out_shape=jax.ShapeDtypeStruct((B, P), jnp.float32),
        grid=grid,
        in_specs=[
            pl.BlockSpec((bt, K), lambda i: (i, 0)),   # lane-dense feature rows
            pl.BlockSpec((K, P), lambda i: (0, 0)),    # expanded weight, VMEM-resident
            pl.BlockSpec((1, P), lambda i: (0, 0)),    # bias, VMEM-resident
        ],
        out_specs=pl.BlockSpec((bt, P), lambda i: (i, 0)),
        compiler_params=pltpu.CompilerParams(
            dimension_semantics=("parallel",),
            vmem_limit_bytes=vmem_limit,
        ),
        cost_estimate=pl.CostEstimate(
            flops=2 * B * K * P,
            transcendentals=0,
            bytes_accessed=B * K * feat_itemsize + K * P * w_itemsize + B * P * 4,
        ),
    )(feats, w_big, b)

    # parameters.reshape(B, -1) is an identity reshape here; slice as in torch.
    return {
        "expression_params": params[:, :n_exp],
        "eyelid_params": params[:, n_exp:n_exp + 2],
        "jaw_params": params[:, n_exp + 2:n_exp + 5],
    }


def _reference(features_nchw, weight, bias, *, n_exp):
    """Pure-JAX reference mirroring the PyTorch forward (post-backbone)."""
    B = features_nchw.shape[0]
    pooled = jnp.mean(features_nchw.astype(jnp.float32), axis=(2, 3))  # [B, C]
    params = pooled @ weight.T.astype(jnp.float32) + bias.astype(jnp.float32)
    params = params.reshape(B, -1)
    return {
        "expression_params": params[:, :n_exp],
        "eyelid_params": jnp.clip(params[:, n_exp:n_exp + 2], 0.0, 1.0),
        "jaw_params": jnp.concatenate(
            [
                jnp.maximum(params[:, n_exp + 2:n_exp + 3], 0.0),
                jnp.clip(params[:, n_exp + 3:n_exp + 5], -0.2, 0.2),
            ],
            axis=-1,
        ),
    }


if __name__ == "__main__":
    # Small, deterministic example. Real backbone gives feature_dim=960, HW=49;
    # this is a small stand-in consistent with the head's contract.
    B, C_FEAT, H, W = 2, 32, 8, 8
    N_EXP = 50
    P = N_EXP + 5

    key = jax.random.PRNGKey(0)
    k_feat, k_w, k_b = jax.random.split(key, 3)

    features = jax.random.normal(k_feat, (B, C_FEAT, H, W), dtype=jnp.float32)

    # nn.Linear default init (uniform +-1/sqrt(fan_in)), then *0.1 per init_weights().
    bound = 1.0 / jnp.sqrt(jnp.float32(C_FEAT))
    weight = jax.random.uniform(k_w, (P, C_FEAT), minval=-bound, maxval=bound) * 0.1
    bias = jax.random.uniform(k_b, (P,), minval=-bound, maxval=bound) * 0.1

    out = expression_encoder_head(features, weight, bias, n_exp=N_EXP)
    out = jax.tree_util.tree_map(jax.block_until_ready, out)

    ref = _reference(features, weight, bias, n_exp=N_EXP)
    # Slightly loose tolerance: the fused K=C*HW reduction runs on the MXU, which
    # may use reduced-precision (bf16-pass) f32 matmuls by default; the slicing /
    # clamp / relu semantics are exact.
    for name in ("expression_params", "eyelid_params", "jaw_params"):
        assert out[name].shape == ref[name].shape, name
        assert jnp.allclose(out[name], ref[name], atol=2e-3, rtol=2e-3), name

    print("KERNEL_OK")
</pallas_src>

<mosaic_0001>
module attributes {stable_mosaic.version = 11 : i64} {
  func.func @_head_kernel(%arg0: i32, %arg1: memref<2x2048xf32, #tpu.memory_space<vmem>>, %arg2: memref<2048x55xf32, #tpu.memory_space<vmem>>, %arg3: memref<1x55xf32, #tpu.memory_space<vmem>>, %arg4: memref<2x55xf32, #tpu.memory_space<vmem>>) attributes {dimension_semantics = [#tpu.dimension_semantics<parallel>], iteration_bounds = array<i64: 1>, scalar_prefetch = 0 : i64, scratch_operands = 0 : i64, tpu.core_type = #tpu.core_type<tc>, window_params = [{transform_indices = @transform_0, window_bounds = array<i64: 2, 2048>}, {pipeline_mode = #tpu.pipeline_mode<synchronous>, transform_indices = @transform_1, window_bounds = array<i64: 2048, 55>}, {pipeline_mode = #tpu.pipeline_mode<synchronous>, transform_indices = @transform_2, window_bounds = array<i64: 1, 55>}, {transform_indices = @transform_3, window_bounds = array<i64: 2, 55>}]} {
    %c0 = arith.constant 0 : index
    %c0_0 = arith.constant 0 : index
    %0 = vector.load %arg1[%c0, %c0_0] : memref<2x2048xf32, #tpu.memory_space<vmem>>, vector<2x2048xf32>
    %c0_1 = arith.constant 0 : index
    %c0_2 = arith.constant 0 : index
    %1 = vector.load %arg2[%c0_1, %c0_2] : memref<2048x55xf32, #tpu.memory_space<vmem>>, vector<2048x55xf32>
    %cst = arith.constant dense<0.000000e+00> : vector<2x55xf32>
    %2 = tpu.matmul %0, %1, %cst {dimension_numbers = #tpu.dot_dimension_numbers<[1], [0], [0], [1], [0, 0, 1, 1], [], []>} : vector<2x2048xf32>, vector<2048x55xf32>, vector<2x55xf32> -> vector<2x55xf32>
    %c0_3 = arith.constant 0 : index
    %c0_4 = arith.constant 0 : index
    %3 = vector.load %arg3[%c0_3, %c0_4] : memref<1x55xf32, #tpu.memory_space<vmem>>, vector<1x55xf32>
    %4 = vector.broadcast %3 : vector<1x55xf32> to vector<2x55xf32>
    %5 = arith.addf %2, %4 : vector<2x55xf32>
    %6 = tpu.iota {dimensions = array<i32: 1>} : vector<2x55xi32>
    %cst_5 = arith.constant 0.000000e+00 : f32
    %cst_6 = arith.constant 1.000000e+00 : f32
    %7 = vector.broadcast %cst_5 : f32 to vector<2x55xf32>
    %8 = arith.maximumf %7, %5 : vector<2x55xf32>
    %9 = vector.broadcast %cst_6 : f32 to vector<2x55xf32>
    %10 = arith.minimumf %9, %8 : vector<2x55xf32>
    %cst_7 = arith.constant 0.000000e+00 : f32
    %11 = vector.broadcast %cst_7 : f32 to vector<2x55xf32>
    %12 = arith.maximumf %5, %11 : vector<2x55xf32>
    %cst_8 = arith.constant -2.000000e-01 : f32
    %cst_9 = arith.constant 2.000000e-01 : f32
    %13 = vector.broadcast %cst_8 : f32 to vector<2x55xf32>
    %14 = arith.maximumf %13, %5 : vector<2x55xf32>
    %15 = vector.broadcast %cst_9 : f32 to vector<2x55xf32>
    %16 = arith.minimumf %15, %14 : vector<2x55xf32>
    %c50_i32 = arith.constant 50 : i32
    %17 = vector.broadcast %c50_i32 : i32 to vector<2x55xi32>
    %18 = arith.cmpi sge, %6, %17 : vector<2x55xi32>
    %c52_i32 = arith.constant 52 : i32
    %19 = vector.broadcast %c52_i32 : i32 to vector<2x55xi32>
    %20 = arith.cmpi slt, %6, %19 : vector<2x55xi32>
    %21 = arith.andi %18, %20 : vector<2x55xi1>
    %22 = arith.select %21, %10, %5 : vector<2x55xi1>, vector<2x55xf32>
    %c52_i32_10 = arith.constant 52 : i32
    %23 = vector.broadcast %c52_i32_10 : i32 to vector<2x55xi32>
    %24 = arith.cmpi eq, %6, %23 : vector<2x55xi32>
    %25 = arith.select %24, %12, %22 : vector<2x55xi1>, vector<2x55xf32>
    %c53_i32 = arith.constant 53 : i32
    %26 = vector.broadcast %c53_i32 : i32 to vector<2x55xi32>
    %27 = arith.cmpi sge, %6, %26 : vector<2x55xi32>
    %c55_i32 = arith.constant 55 : i32
    %28 = vector.broadcast %c55_i32 : i32 to vector<2x55xi32>
    %29 = arith.cmpi slt, %6, %28 : vector<2x55xi32>
    %30 = arith.andi %27, %29 : vector<2x55xi1>
    %31 = arith.select %30, %16, %25 : vector<2x55xi1>, vector<2x55xf32>
    %c0_11 = arith.constant 0 : index
    %c0_12 = arith.constant 0 : index
    %32 = vector.load %arg4[%c0_11, %c0_12] : memref<2x55xf32, #tpu.memory_space<vmem>>, vector<2x55xf32>
    tpu.vector_store %arg4[%c0_11, %c0_12], %31 {strides = array<i32>} : memref<2x55xf32, #tpu.memory_space<vmem>>, vector<2x55xf32>,
    return
  }
  func.func @transform_0(%arg0: i32) -> (i32, i32) {
    %c0_i32 = arith.constant 0 : i32
    %c0_i32_0 = arith.constant 0 : i32
    return %arg0, %c0_i32 : i32, i32
  }
  func.func @transform_1(%arg0: i32) -> (i32, i32) {
    %c0_i32 = arith.constant 0 : i32
    %c0_i32_0 = arith.constant 0 : i32
    %c0_i32_1 = arith.constant 0 : i32
    return %c0_i32, %c0_i32_0 : i32, i32
  }
  func.func @transform_2(%arg0: i32) -> (i32, i32) {
    %c0_i32 = arith.constant 0 : i32
    %c0_i32_0 = arith.constant 0 : i32
    %c0_i32_1 = arith.constant 0 : i32
    return %c0_i32, %c0_i32_0 : i32, i32
  }
  func.func @transform_3(%arg0: i32) -> (i32, i32) {
    %c0_i32 = arith.constant 0 : i32
    %c0_i32_0 = arith.constant 0 : i32
    return %arg0, %c0_i32 : i32, i32
  }
}

</mosaic_0001>

<bundles_post_ra>
// kernel: tpu_custom_call.1
= control target key start
LH: loop header
LB: loop body
LE: loop exit
PB: predicated region body
PF: predicated region fallthrough
CT: control target
= control target key end

     0   :  { %v1530_v47 = vmov 1983009808   ;;  %v290_v49 = vlaneseq  ;;  %s2389_s0 = inlined_call_operand.vmem [shape: f32[2,2048], index: 0, kind: input, shape index: {}]   ;;  %s2390_s1 = inlined_call_operand.vmem [shape: f32[2048,55], index: 1, kind: input, shape index: {}]   ;;  %s2391_s2 = inlined_call_operand.vmem [shape: f32[1,55], index: 2, kind: input, shape index: {}]   ;;  %s2392_s3 = inlined_call_operand.hbm [shape: f32[2,55], index: 3, kind: output, shape index: {}]  }
   0x1   :  { %v35_v0 = vld [vmem:[%s2390_s1 + $0x80] sm:$0xff]  ;;  %v36_v1 = vld [vmem:[%s2390_s1 + $0x88] sm:$0xff]  ;;  %v37_v11 = vld [vmem:[%s2390_s1 + $0x90] sm:$0xff]  ;;  %v288_v48 = vunpack.c.l.s4 %v1530_v47 }
   0x2   :  { %v19_v2 = vld [vmem:[%s2390_s1] sm:$0xff]  ;;  %v1244_v3 = vpack.c.bf16 %v36_v1, %v35_v0  ;;  %v20_v4 = vld [vmem:[%s2390_s1 + $0x8] sm:$0xff]  ;;  %v38_v13 = vld [vmem:[%s2390_s1 + $0x98] sm:$0xff]  ;;  %v291_v0 = vshrl.u32 %v290_v49, 7 }
   0x3   :  { %v67_v5 = vld [vmem:[%s2390_s1 + $0x180] sm:$0xff]  ;;  %v68_v6 = vld [vmem:[%s2390_s1 + $0x188] sm:$0xff]  ;;  %v1246_v7 = vpack.c.bf16 %v20_v4, %v19_v2  ;;  %v21_v14 = vld [vmem:[%s2390_s1 + $0x10] sm:$0xff]  ;;  %v1248_v16 = vpack.c.bf16 %v38_v13, %v37_v11  ;;  %v289_v63 = vunpack.c.0.s8 %v288_v48 }
   0x4   :  { %v1276_v8 = vpack.c.bf16 %v68_v6, %v67_v5  ;;  %v51_v9 = vld [vmem:[%s2390_s1 + $0x100] sm:$0xff]  ;;  %v52_v10 = vld [vmem:[%s2390_s1 + $0x108] sm:$0xff]  ;;  %1245 = vmatprep.subr.bf16.mxu0 %v1244_v3  ;;  %v22_v15 = vld [vmem:[%s2390_s1 + $0x18] sm:$0xff] }
   0x5   :  { %v1278_v12 = vpack.c.bf16 %v52_v10, %v51_v9  ;;  %1247 = vmatpush3.bf16.msra.mxu0 %v1246_v7  ;;  %v1250_v17 = vpack.c.bf16 %v22_v15, %v21_v14  ;;  %v69_v18 = vld [vmem:[%s2390_s1 + $0x190] sm:$0xff]  ;;  %v70_v19 = vld [vmem:[%s2390_s1 + $0x198] sm:$0xff]  ;;  %v39_v23 = vld [vmem:[%s2390_s1 + $0xa0] sm:$0xff]  ;;  %v1703_v13 = vsub.s32 %v289_v63, %v291_v0 }
   0x6   :  { %1277 = vmatprep.subr.bf16.mxu1 %v1276_v8  ;;  %v53_v20 = vld [vmem:[%s2390_s1 + $0x110] sm:$0xff]  ;;  %v1280_v21 = vpack.c.bf16 %v70_v19, %v69_v18  ;;  %v54_v22 = vld [vmem:[%s2390_s1 + $0x118] sm:$0xff]  ;;  %v40_v24 = vld [vmem:[%s2390_s1 + $0xa8] sm:$0xff]  ;;  %1249 = vmatprep.subr.bf16.mxu0 %v1248_v16 }
   0x7   :  { %1279 = vmatpush3.bf16.msra.mxu1 %v1278_v12  ;;  %v1282_v25 = vpack.c.bf16 %v54_v22, %v53_v20  ;;  %v1252_v26 = vpack.c.bf16 %v40_v24, %v39_v23  ;;  %v23_v27 = vld [vmem:[%s2390_s1 + $0x20] sm:$0xff]  ;;  %v24_v28 = vld [vmem:[%s2390_s1 + $0x28] sm:$0xff]  ;;  %v41_v35 = vld [vmem:[%s2390_s1 + $0xb0] sm:$0xff] }
   0x8   :  { %v71_v29 = vld [vmem:[%s2390_s1 + $0x1a0] sm:$0xff]  ;;  %1281 = vmatprep.subr.bf16.mxu1 %v1280_v21  ;;  %v72_v30 = vld [vmem:[%s2390_s1 + $0x1a8] sm:$0xff]  ;;  %v1254_v33 = vpack.c.bf16 %v24_v28, %v23_v27  ;;  %v42_v36 = vld [vmem:[%s2390_s1 + $0xb8] sm:$0xff] }
   0x9   :  { %v55_v31 = vld [vmem:[%s2390_s1 + $0x120] sm:$0xff]  ;;  %v56_v32 = vld [vmem:[%s2390_s1 + $0x128] sm:$0xff]  ;;  %1251 = vmatpush3.bf16.msra.mxu0 %v1250_v17  ;;  %v1284_v34 = vpack.c.bf16 %v72_v30, %v71_v29  ;;  %v25_v37 = vld [vmem:[%s2390_s1 + $0x30] sm:$0xff]  ;;  %v1256_v39 = vpack.c.bf16 %v42_v36, %v41_v35 }
   0xa   :  { %1253 = vmatprep.subr.bf16.mxu0 %v1252_v26  ;;  %v1286_v38 = vpack.c.bf16 %v56_v32, %v55_v31  ;;  %v26_v40 = vld [vmem:[%s2390_s1 + $0x38] sm:$0xff]  ;;  %v73_v41 = vld [vmem:[%s2390_s1 + $0x1b0] sm:$0xff]  ;;  %v43_v46 = vld [vmem:[%s2390_s1 + $0xc0] sm:$0xff] }
   0xb   :  { %1283 = vmatpush3.bf16.msra.mxu1 %v1282_v25  ;;  %v74_v42 = vld [vmem:[%s2390_s1 + $0x1b8] sm:$0xff]  ;;  %v57_v44 = vld [vmem:[%s2390_s1 + $0x130] sm:$0xff]  ;;  %v44_v50 = vld [vmem:[%s2390_s1 + $0xc8] sm:$0xff]  ;;  %v1258_v51 = vpack.c.bf16 %v26_v40, %v25_v37 }
   0xc   :  { %1285 = vmatprep.subr.bf16.mxu1 %v1284_v34  ;;  %v1288_v43 = vpack.c.bf16 %v74_v42, %v73_v41  ;;  %v58_v45 = vld [vmem:[%s2390_s1 + $0x138] sm:$0xff]  ;;  %v75_v52 = vld [vmem:[%s2390_s1 + $0x1c0] sm:$0xff]  ;;  %v76_v53 = vld [vmem:[%s2390_s1 + $0x1c8] sm:$0xff]  ;;  %v1260_v55 = vpack.c.bf16 %v44_v50, %v43_v46 }
   0xd   :  { %1255 = vmatpush3.bf16.msra.mxu0 %v1254_v33  ;;  %v1290_v54 = vpack.c.bf16 %v58_v45, %v57_v44  ;;  %v27_v56 = vld [vmem:[%s2390_s1 + $0x40] sm:$0xff]  ;;  %v28_v57 = vld [vmem:[%s2390_s1 + $0x48] sm:$0xff]  ;;  %v1292_v59 = vpack.c.bf16 %v76_v53, %v75_v52  ;;  %v45_v61 = vld [vmem:[%s2390_s1 + $0xd0] sm:$0xff] }
   0xe   :  { %1257 = vmatprep.subr.bf16.mxu0 %v1256_v39  ;;  %v59_v58 = vld [vmem:[%s2390_s1 + $0x140] sm:$0xff]  ;;  %v60_v60 = vld [vmem:[%s2390_s1 + $0x148] sm:$0xff]  ;;  %v46_v62 = vld [vmem:[%s2390_s1 + $0xd8] sm:$0xff]  ;;  %v1262_v3 = vpack.c.bf16 %v28_v57, %v27_v56 }
   0xf   :  { %1287 = vmatpush3.bf16.msra.mxu1 %v1286_v38  ;;  %v77_v1 = vld [vmem:[%s2390_s1 + $0x1d0] sm:$0xff]  ;;  %v78_v2 = vld [vmem:[%s2390_s1 + $0x1d8] sm:$0xff]  ;;  %v1294_v4 = vpack.c.bf16 %v60_v60, %v59_v58  ;;  %v1264_v5 = vpack.c.bf16 %v46_v62, %v45_v61  ;;  %v47_v11 = vld [vmem:[%s2390_s1 + $0xe0] sm:$0xff] }
  0x10   :  { %1289 = vmatprep.subr.bf16.mxu1 %v1288_v43  ;;  %v29_v6 = vld [vmem:[%s2390_s1 + $0x50] sm:$0xff]  ;;  %v30_v7 = vld [vmem:[%s2390_s1 + $0x58] sm:$0xff]  ;;  %v1296_v9 = vpack.c.bf16 %v78_v2, %v77_v1  ;;  %v48_v12 = vld [vmem:[%s2390_s1 + $0xe8] sm:$0xff] }
  0x11   :  { %1259 = vmatpush3.bf16.msra.mxu0 %v1258_v51  ;;  %v61_v8 = vld [vmem:[%s2390_s1 + $0x150] sm:$0xff]  ;;  %v62_v10 = vld [vmem:[%s2390_s1 + $0x158] sm:$0xff]  ;;  %v79_v14 = vld [vmem:[%s2390_s1 + $0x1e0] sm:$0xff]  ;;  %v1266_v16 = vpack.c.bf16 %v30_v7, %v29_v6  ;;  %v1268_v19 = vpack.c.bf16 %v48_v12, %v47_v11 }
  0x12   :  { %1261 = vmatprep.subr.bf16.mxu0 %v1260_v55  ;;  %v80_v15 = vld [vmem:[%s2390_s1 + $0x1e8] sm:$0xff]  ;;  %v31_v17 = vld [vmem:[%s2390_s1 + $0x60] sm:$0xff]  ;;  %v1298_v18 = vpack.c.bf16 %v62_v10, %v61_v8  ;;  %v49_v25 = vld [vmem:[%s2390_s1 + $0xf0] sm:$0xff] }
  0x13   :  { %1291 = vmatpush3.bf16.msra.mxu1 %v1290_v54  ;;  %v32_v20 = vld [vmem:[%s2390_s1 + $0x68] sm:$0xff]  ;;  %v63_v21 = vld [vmem:[%s2390_s1 + $0x160] sm:$0xff]  ;;  %v1300_v23 = vpack.c.bf16 %v80_v15, %v79_v14  ;;  %v50_v26 = vld [vmem:[%s2390_s1 + $0xf8] sm:$0xff] }
  0x14   :  { %1293 = vmatprep.subr.bf16.mxu1 %v1292_v59  ;;  %v15_v22 = vld [vmem:[%s2389_s0] sm:$0xff]  ;;  %v64_v24 = vld [vmem:[%s2390_s1 + $0x168] sm:$0xff]  ;;  %v81_v29 = vld [vmem:[%s2390_s1 + $0x1f0] sm:$0xff]  ;;  %v1270_v31 = vpack.c.bf16 %v32_v20, %v31_v17  ;;  %v1272_v35 = vpack.c.bf16 %v50_v26, %v49_v25 }
  0x15   :  { %1263 = vmatpush3.bf16.msra.mxu0 %v1262_v3  ;;  %v293_v27 = vrot.slane %v15_v22, %v1703_v13  ;;  %v286_v28 = vcombine.high %v15_v22, %v15_v22  ;;  %v82_v30 = vld [vmem:[%s2390_s1 + $0x1f8] sm:$0xff]  ;;  %v1302_v34 = vpack.c.bf16 %v64_v24, %v63_v21  ;;  %v33_v36 = vld [vmem:[%s2390_s1 + $0x70] sm:$0xff]  ;;  %v99_v41 = vld [vmem:[%s2390_s1 + $0x280] sm:$0xff] }
  0x16   :  { %1265 = vmatprep.subr.bf16.mxu0 %v1264_v5  ;;  %v34_v37 = vld [vmem:[%s2390_s1 + $0x78] sm:$0xff]  ;;  %v65_v38 = vld [vmem:[%s2390_s1 + $0x170] sm:$0xff]  ;;  %v1304_v39 = vpack.c.bf16 %v82_v30, %v81_v29  ;;  %v100_v42 = vld [vmem:[%s2390_s1 + $0x288] sm:$0xff] }
  0x17   :  { %1295 = vmatpush3.bf16.msra.mxu1 %v1294_v4  ;;  %v301_v32 = vcombine.high %v293_v27, %v293_v27  ;;  %v300_v33 = vrot.slane %v286_v28, %v1703_v13  ;;  %v66_v40 = vld [vmem:[%s2390_s1 + $0x178] sm:$0xff]  ;;  %v131_v44 = vld [vmem:[%s2390_s1 + $0x380] sm:$0xff]  ;;  %v132_v45 = vld [vmem:[%s2390_s1 + $0x388] sm:$0xff]  ;;  %v1274_v46 = vpack.c.bf16 %v34_v37, %v33_v36  ;;  %v1308_v48 = vpack.c.bf16 %v100_v42, %v99_v41 }
  0x18   :  { %1297 = vmatprep.subr.bf16.mxu1 %v1296_v9  ;;  %v1306_v47 = vpack.c.bf16 %v66_v40, %v65_v38  ;;  %v83_v50 = vld [vmem:[%s2390_s1 + $0x200] sm:$0xff]  ;;  %v84_v51 = vld [vmem:[%s2390_s1 + $0x208] sm:$0xff]  ;;  %v1340_v53 = vpack.c.bf16 %v132_v45, %v131_v44  ;;  %v101_v55 = vld [vmem:[%s2390_s1 + $0x290] sm:$0xff] }
  0x19   :  { %1267 = vmatpush3.bf16.msra.mxu0 %v1266_v16  ;;  %434 = vmatprep.mubr.f32.mxu0 %v301_v32  ;;  %v302_v43 = vcombine.high %v300_v33, %v300_v33  ;;  %v115_v52 = vld [vmem:[%s2390_s1 + $0x300] sm:$0xff]  ;;  %v116_v54 = vld [vmem:[%s2390_s1 + $0x308] sm:$0xff]  ;;  %v102_v56 = vld [vmem:[%s2390_s1 + $0x298] sm:$0xff]  ;;  %v1310_v59 = vpack.c.bf16 %v84_v51, %v83_v50 }
  0x1a   :  { %1269 = vmatprep.subr.bf16.mxu0 %v1268_v19  ;;  %v133_v57 = vld [vmem:[%s2390_s1 + $0x390] sm:$0xff]  ;;  %v134_v58 = vld [vmem:[%s2390_s1 + $0x398] sm:$0xff]  ;;  %v1342_v60 = vpack.c.bf16 %v116_v54, %v115_v52  ;;  %v1312_v61 = vpack.c.bf16 %v102_v56, %v101_v55  ;;  %v103_v3 = vld [vmem:[%s2390_s1 + $0x2a0] sm:$0xff] }
  0x1b   :  { %1299 = vmatpush3.bf16.msra.mxu1 %v1298_v18  ;;  %504 = vmatprep.mubr.f32.mxu1 %v302_v43  ;;  %v85_v62 = vld [vmem:[%s2390_s1 + $0x210] sm:$0xff]  ;;  %v86_v63 = vld [vmem:[%s2390_s1 + $0x218] sm:$0xff]  ;;  %v1344_v1 = vpack.c.bf16 %v134_v58, %v133_v57  ;;  %v104_v4 = vld [vmem:[%s2390_s1 + $0x2a8] sm:$0xff] }
  0x1c   :  { %1301 = vmatprep.subr.bf16.mxu1 %v1300_v23  ;;  %v117_v0 = vld [vmem:[%s2390_s1 + $0x310] sm:$0xff]  ;;  %v118_v2 = vld [vmem:[%s2390_s1 + $0x318] sm:$0xff]  ;;  %v135_v5 = vld [vmem:[%s2390_s1 + $0x3a0] sm:$0xff]  ;;  %v1314_v7 = vpack.c.bf16 %v86_v63, %v85_v62  ;;  %v1316_v9 = vpack.c.bf16 %v104_v4, %v103_v3 }
  0x1d   :  { %1271 = vmatpush3.bf16.msra.mxu0 %v1270_v31  ;;  %v136_v6 = vld [vmem:[%s2390_s1 + $0x3a8] sm:$0xff]  ;;  %v1346_v8 = vpack.c.bf16 %v118_v2, %v117_v0  ;;  %v87_v10 = vld [vmem:[%s2390_s1 + $0x220] sm:$0xff]  ;;  %v105_v16 = vld [vmem:[%s2390_s1 + $0x2b0] sm:$0xff] }
  0x1e   :  { %1273 = vmatprep.subr.bf16.mxu0 %v1272_v35  ;;  %v88_v11 = vld [vmem:[%s2390_s1 + $0x228] sm:$0xff]  ;;  %v119_v12 = vld [vmem:[%s2390_s1 + $0x320] sm:$0xff]  ;;  %v1348_v14 = vpack.c.bf16 %v136_v6, %v135_v5  ;;  %v106_v17 = vld [vmem:[%s2390_s1 + $0x2b8] sm:$0xff] }
  0x1f   :  { %1303 = vmatpush3.bf16.msra.mxu1 %v1302_v34  ;;  %v120_v15 = vld [vmem:[%s2390_s1 + $0x328] sm:$0xff]  ;;  %v137_v18 = vld [vmem:[%s2390_s1 + $0x3b0] sm:$0xff]  ;;  %v138_v19 = vld [vmem:[%s2390_s1 + $0x3b8] sm:$0xff]  ;;  %v1318_v20 = vpack.c.bf16 %v88_v11, %v87_v10  ;;  %v1320_v22 = vpack.c.bf16 %v106_v17, %v105_v16 }
  0x20   :  { %1305 = vmatprep.subr.bf16.mxu1 %v1304_v39  ;;  %v1350_v21 = vpack.c.bf16 %v120_v15, %v119_v12  ;;  %v89_v23 = vld [vmem:[%s2390_s1 + $0x230] sm:$0xff]  ;;  %v90_v24 = vld [vmem:[%s2390_s1 + $0x238] sm:$0xff]  ;;  %v1352_v26 = vpack.c.bf16 %v138_v19, %v137_v18  ;;  %v107_v28 = vld [vmem:[%s2390_s1 + $0x2c0] sm:$0xff] }
  0x21   :  { %1275 = vmatpush3.bf16.msra.mxu0 %v1274_v46  ;;  %v121_v25 = vld [vmem:[%s2390_s1 + $0x330] sm:$0xff]  ;;  %v108_v29 = vld [vmem:[%s2390_s1 + $0x2c8] sm:$0xff]  ;;  %v139_v30 = vld [vmem:[%s2390_s1 + $0x3c0] sm:$0xff] }
  0x22   :  { %1309 = vmatprep.subr.bf16.mxu0 %v1308_v48  ;;  %v140_v31 = vld [vmem:[%s2390_s1 + $0x3c8] sm:$0xff]  ;;  %v1324_v37 = vpack.c.bf16 %v108_v29, %v107_v28  ;;  %v91_v38 = vld [vmem:[%s2390_s1 + $0x240] sm:$0xff]  ;;  %v109_v43 = vld [vmem:[%s2390_s1 + $0x2d0] sm:$0xff] }
  0x23   :  { %1307 = vmatpush3.bf16.msra.mxu1 %v1306_v47  ;;  %v16_v32 = vld [vmem:[%s2389_s0 + $0x8] sm:$0xff]  ;;  %v123_v40 = vld [vmem:[%s2390_s1 + $0x340] sm:$0xff]  ;;  %v1356_v41 = vpack.c.bf16 %v140_v31, %v139_v30  ;;  %v110_v44 = vld [vmem:[%s2390_s1 + $0x2d8] sm:$0xff] }
  0x24   :  { %1341 = vmatprep.subr.bf16.mxu1 %v1340_v53  ;;  %435 = vmatmul.mubr.f32.vlgmr.msra.gmra.mrb[0].mxu0 %v293_v27  ;;  %v122_v27 = vld [vmem:[%s2390_s1 + $0x338] sm:$0xff]  ;;  %v1864_v34 = vrot.slane %v16_v32, %v1703_v13  ;;  %v303_v35 = vcombine.high %v16_v32, %v16_v32  ;;  %v92_v39 = vld [vmem:[%s2390_s1 + $0x248] sm:$0xff]  ;;  %v141_v47 = vld [vmem:[%s2390_s1 + $0x3d0] sm:$0xff]  ;;  %v1328_v53 = vpack.c.bf16 %v110_v44, %v109_v43 }
  0x25   :  { %1311 = vmatpush3.bf16.msra.mxu0 %v1310_v59  ;;  %v1354_v36 = vpack.c.bf16 %v122_v27, %v121_v25  ;;  %v124_v42 = vld [vmem:[%s2390_s1 + $0x348] sm:$0xff]  ;;  %v142_v48 = vld [vmem:[%s2390_s1 + $0x3d8] sm:$0xff]  ;;  %v1326_v50 = vpack.c.bf16 %v92_v39, %v91_v38  ;;  %v93_v54 = vld [vmem:[%s2390_s1 + $0x250] sm:$0xff] }
  0x26   :  { %505 = vmatmul.mubr.f32.vlgmr.msra.gmra.mrb[0].mxu1 %v300_v33  ;;  %1313 = vmatprep.subr.bf16.mxu0 %v1312_v61  ;;  %v1322_v33 = vpack.c.bf16 %v90_v24, %v89_v23  ;;  %v318_v45 = vcombine.high %v1864_v34, %v1864_v34  ;;  %v1887_v46 = vrot.slane %v303_v35, %v1703_v13  ;;  %v94_v55 = vld [vmem:[%s2390_s1 + $0x258] sm:$0xff]  ;;  %v125_v56 = vld [vmem:[%s2390_s1 + $0x350] sm:$0xff]  ;;  %v111_v59 = vld [vmem:[%s2390_s1 + $0x2e0] sm:$0xff] }
  0x27   :  { %1343 = vmatpush3.bf16.msra.mxu1 %v1342_v60  ;;  %v1358_v52 = vpack.c.bf16 %v124_v42, %v123_v40  ;;  %v1360_v57 = vpack.c.bf16 %v142_v48, %v141_v47  ;;  %v126_v58 = vld [vmem:[%s2390_s1 + $0x358] sm:$0xff]  ;;  %v112_v60 = vld [vmem:[%s2390_s1 + $0x2e8] sm:$0xff]  ;;  %v143_v61 = vld [vmem:[%s2390_s1 + $0x3e0] sm:$0xff]  ;;  %v1330_v63 = vpack.c.bf16 %v94_v55, %v93_v54 }
  0x28   :  { %1345 = vmatprep.subr.bf16.mxu1 %v1344_v1  ;;  %574 = vmatprep.mubr.f32.mxu0 %v318_v45  ;;  %v319_v51 = vcombine.high %v1887_v46, %v1887_v46  ;;  %v144_v62 = vld [vmem:[%s2390_s1 + $0x3e8] sm:$0xff]  ;;  %v1362_v0 = vpack.c.bf16 %v126_v58, %v125_v56  ;;  %v1332_v1 = vpack.c.bf16 %v112_v60, %v111_v59  ;;  %v95_v2 = vld [vmem:[%s2390_s1 + $0x260] sm:$0xff]  ;;  %v146_v10 = vld [vmem:[%s2390_s1 + $0x3f8] sm:$0xff] }
  0x29   :  { %1315 = vmatpush3.bf16.msra.mxu0 %v1314_v7  ;;  %v96_v3 = vld [vmem:[%s2390_s1 + $0x268] sm:$0xff]  ;;  %v127_v4 = vld [vmem:[%s2390_s1 + $0x360] sm:$0xff]  ;;  %v1364_v5 = vpack.c.bf16 %v144_v62, %v143_v61  ;;  %v113_v7 = vld [vmem:[%s2390_s1 + $0x2f0] sm:$0xff] }
  0x2a   :  { %1317 = vmatprep.subr.bf16.mxu0 %v1316_v9  ;;  %644 = vmatprep.mubr.f32.mxu1 %v319_v51  ;;  %v128_v6 = vld [vmem:[%s2390_s1 + $0x368] sm:$0xff]  ;;  %v145_v9 = vld [vmem:[%s2390_s1 + $0x3f0] sm:$0xff]  ;;  %v1334_v11 = vpack.c.bf16 %v96_v3, %v95_v2  ;;  %v98_v16 = vld [vmem:[%s2390_s1 + $0x278] sm:$0xff] }
  0x2b   :  { %1347 = vmatpush3.bf16.msra.mxu1 %v1346_v8  ;;  %v114_v8 = vld [vmem:[%s2390_s1 + $0x2f8] sm:$0xff]  ;;  %v1366_v12 = vpack.c.bf16 %v128_v6, %v127_v4  ;;  %v97_v15 = vld [vmem:[%s2390_s1 + $0x270] sm:$0xff]  ;;  %v1368_v18 = vpack.c.bf16 %v146_v10, %v145_v9  ;;  %v196_v23 = vld [vmem:[%s2390_s1 + $0x588] sm:$0xff] }
  0x2c   :  { %1349 = vmatprep.subr.bf16.mxu1 %v1348_v14  ;;  %v1336_v14 = vpack.c.bf16 %v114_v8, %v113_v7  ;;  %v129_v17 = vld [vmem:[%s2390_s1 + $0x370] sm:$0xff]  ;;  %v130_v19 = vld [vmem:[%s2390_s1 + $0x378] sm:$0xff]  ;;  %v1338_v24 = vpack.c.bf16 %v98_v16, %v97_v15  ;;  %v147_v25 = vld [vmem:[%s2390_s1 + $0x400] sm:$0xff] }
  0x2d   :  { %1319 = vmatpush3.bf16.msra.mxu0 %v1318_v20  ;;  %v163_v20 = vld [vmem:[%s2390_s1 + $0x480] sm:$0xff]  ;;  %v148_v28 = vld [vmem:[%s2390_s1 + $0x408] sm:$0xff]  ;;  %v165_v32 = vld [vmem:[%s2390_s1 + $0x490] sm:$0xff] }
  0x2e   :  { %1321 = vmatprep.subr.bf16.mxu0 %v1320_v22  ;;  %v195_v22 = vld [vmem:[%s2390_s1 + $0x580] sm:$0xff]  ;;  %v180_v30 = vld [vmem:[%s2390_s1 + $0x508] sm:$0xff]  ;;  %v197_v35 = vld [vmem:[%s2390_s1 + $0x590] sm:$0xff] }
  0x2f   :  { %1351 = vmatpush3.bf16.msra.mxu1 %v1350_v21  ;;  %v164_v21 = vld [vmem:[%s2390_s1 + $0x488] sm:$0xff]  ;;  %v179_v29 = vld [vmem:[%s2390_s1 + $0x500] sm:$0xff]  ;;  %v1404_v31 = vpack.c.bf16 %v196_v23, %v195_v22  ;;  %v17_v39 = vld [vmem:[%s2389_s0 + $0x10] sm:$0xff] }
  0x30   :  { %1353 = vmatprep.subr.bf16.mxu1 %v1352_v26  ;;  %v1370_v26 = vpack.c.bf16 %v130_v19, %v129_v17  ;;  %v1372_v27 = vpack.c.bf16 %v164_v21, %v163_v20  ;;  %v1406_v38 = vpack.c.bf16 %v180_v30, %v179_v29  ;;  %v150_v42 = vld [vmem:[%s2390_s1 + $0x418] sm:$0xff]  ;;  %v181_v43 = vld [vmem:[%s2390_s1 + $0x510] sm:$0xff]  ;;  %v2006_v44 = vrot.slane %v17_v39, %v1703_v13  ;;  %v168_v51 = vld [vmem:[%s2390_s1 + $0x4a8] sm:$0xff] }
  0x31   :  { %1323 = vmatpush3.bf16.msra.mxu0 %v1322_v33  ;;  %v166_v33 = vld [vmem:[%s2390_s1 + $0x498] sm:$0xff]  ;;  %v320_v45 = vcombine.high %v17_v39, %v17_v39  ;;  %v151_v58 = vld [vmem:[%s2390_s1 + $0x420] sm:$0xff]  ;;  %v152_v59 = vld [vmem:[%s2390_s1 + $0x428] sm:$0xff] }
  0x32   :  { %1325 = vmatprep.subr.bf16.mxu0 %v1324_v37  ;;  %v1374_v37 = vpack.c.bf16 %v148_v28, %v147_v25  ;;  %v1376_v40 = vpack.c.bf16 %v166_v33, %v165_v32  ;;  %v182_v48 = vld [vmem:[%s2390_s1 + $0x518] sm:$0xff]  ;;  %v335_v54 = vcombine.high %v2006_v44, %v2006_v44  ;;  %v183_v60 = vld [vmem:[%s2390_s1 + $0x520] sm:$0xff]  ;;  %v184_v62 = vld [vmem:[%s2390_s1 + $0x528] sm:$0xff]  ;;  %v1382_v3 = vpack.c.bf16 %v152_v59, %v151_v58 }
  0x33   :  { %1355 = vmatpush3.bf16.msra.mxu1 %v1354_v36  ;;  %v198_v36 = vld [vmem:[%s2390_s1 + $0x598] sm:$0xff]  ;;  %v2027_v55 = vrot.slane %v320_v45, %v1703_v13  ;;  %v1414_v4 = vpack.c.bf16 %v184_v62, %v183_v60  ;;  %v153_v6 = vld [vmem:[%s2390_s1 + $0x430] sm:$0xff]  ;;  %v204_v15 = vld [vmem:[%s2390_s1 + $0x5c8] sm:$0xff] }
  0x34   :  { %1357 = vmatprep.subr.bf16.mxu1 %v1356_v41  ;;  %v149_v41 = vld [vmem:[%s2390_s1 + $0x410] sm:$0xff]  ;;  %v1408_v47 = vpack.c.bf16 %v198_v36, %v197_v35  ;;  %v202_v2 = vld [vmem:[%s2390_s1 + $0x5b8] sm:$0xff]  ;;  %v155_v19 = vld [vmem:[%s2390_s1 + $0x440] sm:$0xff] }
  0x35   :  { %1327 = vmatpush3.bf16.msra.mxu0 %v1326_v50  ;;  %v167_v50 = vld [vmem:[%s2390_s1 + $0x4a0] sm:$0xff]  ;;  %v1378_v56 = vpack.c.bf16 %v150_v42, %v149_v41  ;;  %v154_v7 = vld [vmem:[%s2390_s1 + $0x438] sm:$0xff]  ;;  %v185_v8 = vld [vmem:[%s2390_s1 + $0x530] sm:$0xff] }
  0x36   :  { %1329 = vmatprep.subr.bf16.mxu0 %v1328_v53  ;;  %v200_v53 = vld [vmem:[%s2390_s1 + $0x5a8] sm:$0xff]  ;;  %v186_v10 = vld [vmem:[%s2390_s1 + $0x538] sm:$0xff]  ;;  %v1386_v16 = vpack.c.bf16 %v154_v7, %v153_v6  ;;  %v187_v21 = vld [vmem:[%s2390_s1 + $0x540] sm:$0xff] }
  0x37   :  { %1359 = vmatpush3.bf16.msra.mxu1 %v1358_v52  ;;  %v199_v52 = vld [vmem:[%s2390_s1 + $0x5a0] sm:$0xff]  ;;  %v1418_v17 = vpack.c.bf16 %v186_v10, %v185_v8  ;;  %v156_v20 = vld [vmem:[%s2390_s1 + $0x448] sm:$0xff]  ;;  %v174_v25 = vld [vmem:[%s2390_s1 + $0x4d8] sm:$0xff] }
  0x38   :  { %1361 = vmatprep.subr.bf16.mxu1 %v1360_v57  ;;  %v1380_v57 = vpack.c.bf16 %v168_v51, %v167_v50  ;;  %v1412_v61 = vpack.c.bf16 %v200_v53, %v199_v52  ;;  %v188_v23 = vld [vmem:[%s2390_s1 + $0x548] sm:$0xff]  ;;  %v1390_v28 = vpack.c.bf16 %v156_v20, %v155_v19  ;;  %v158_v32 = vld [vmem:[%s2390_s1 + $0x458] sm:$0xff]  ;;  %v189_v33 = vld [vmem:[%s2390_s1 + $0x550] sm:$0xff] }
  0x39   :  { %1331 = vmatpush3.bf16.msra.mxu0 %v1330_v63  ;;  %v169_v63 = vld [vmem:[%s2390_s1 + $0x4b0] sm:$0xff]  ;;  %v1422_v29 = vpack.c.bf16 %v188_v23, %v187_v21  ;;  %v190_v36 = vld [vmem:[%s2390_s1 + $0x558] sm:$0xff]  ;;  %v207_v39 = vld [vmem:[%s2390_s1 + $0x5e0] sm:$0xff] }
  0x3a   :  { %1333 = vmatprep.subr.bf16.mxu0 %v1332_v1  ;;  %v201_v1 = vld [vmem:[%s2390_s1 + $0x5b0] sm:$0xff]  ;;  %v159_v42 = vld [vmem:[%s2390_s1 + $0x460] sm:$0xff]  ;;  %v192_v50 = vld [vmem:[%s2390_s1 + $0x568] sm:$0xff] }
  0x3b   :  { %1363 = vmatpush3.bf16.msra.mxu1 %v1362_v0  ;;  %v170_v0 = vld [vmem:[%s2390_s1 + $0x4b8] sm:$0xff]  ;;  %v1416_v9 = vpack.c.bf16 %v202_v2, %v201_v1  ;;  %v177_v52 = vld [vmem:[%s2390_s1 + $0x4f0] sm:$0xff] }
  0x3c   :  { %1365 = vmatprep.subr.bf16.mxu1 %v1364_v5  ;;  %v1384_v5 = vpack.c.bf16 %v170_v0, %v169_v63  ;;  %v178_v53 = vld [vmem:[%s2390_s1 + $0x4f8] sm:$0xff] }
  0x3d   :  { %1335 = vmatpush3.bf16.msra.mxu0 %v1334_v11  ;;  %v171_v11 = vld [vmem:[%s2390_s1 + $0x4c0] sm:$0xff] }
  0x3e   :  { %1337 = vmatprep.subr.bf16.mxu0 %v1336_v14  ;;  %v203_v14 = vld [vmem:[%s2390_s1 + $0x5c0] sm:$0xff] }
  0x3f   :  { %1367 = vmatpush3.bf16.msra.mxu1 %v1366_v12  ;;  %v172_v12 = vld [vmem:[%s2390_s1 + $0x4c8] sm:$0xff]  ;;  %v1420_v22 = vpack.c.bf16 %v204_v15, %v203_v14 }
  0x40   :  { %1369 = vmatprep.subr.bf16.mxu1 %v1368_v18  ;;  %v1388_v18 = vpack.c.bf16 %v172_v12, %v171_v11 }
  0x41   :  { %1339 = vmatpush3.bf16.msra.mxu0 %v1338_v24  ;;  %v173_v24 = vld [vmem:[%s2390_s1 + $0x4d0] sm:$0xff] }
  0x42   :  { %1373 = vmatprep.subr.bf16.mxu0 %v1372_v27  ;;  %v206_v27 = vld [vmem:[%s2390_s1 + $0x5d8] sm:$0xff]  ;;  %v1392_v30 = vpack.c.bf16 %v174_v25, %v173_v24 }
  0x43   :  { %1371 = vmatpush3.bf16.msra.mxu1 %v1370_v26  ;;  %v205_v26 = vld [vmem:[%s2390_s1 + $0x5d0] sm:$0xff] }
  0x44   :  { %1405 = vmatprep.subr.bf16.mxu1 %v1404_v31  ;;  %575 = vmatmul.mubr.f32.vlgmr.msra.gmra.mrb[2].mxu0 %v1864_v34  ;;  %v1410_v34 = vpack.c.bf16 %v182_v48, %v181_v43  ;;  %v157_v31 = vld [vmem:[%s2390_s1 + $0x450] sm:$0xff]  ;;  %v1424_v35 = vpack.c.bf16 %v206_v27, %v205_v26  ;;  %v1426_v43 = vpack.c.bf16 %v190_v36, %v189_v33  ;;  %v191_v48 = vld [vmem:[%s2390_s1 + $0x560] sm:$0xff] }
  0x45   :  { %1375 = vmatpush3.bf16.msra.mxu0 %v1374_v37  ;;  %714 = vmatprep.mubr.f32.mxu0 %v335_v54  ;;  %v175_v37 = vld [vmem:[%s2390_s1 + $0x4e0] sm:$0xff]  ;;  %v1394_v41 = vpack.c.bf16 %v158_v32, %v157_v31 }
  0x46   :  { %645 = vmatmul.mubr.f32.vlgmr.msra.gmra.mrb[2].mxu1 %v1887_v46  ;;  %1377 = vmatprep.subr.bf16.mxu0 %v1376_v40  ;;  %v336_v46 = vcombine.high %v2027_v55, %v2027_v55  ;;  %v208_v40 = vld [vmem:[%s2390_s1 + $0x5e8] sm:$0xff] }
  0x47   :  { %1407 = vmatpush3.bf16.msra.mxu1 %v1406_v38  ;;  %v176_v38 = vld [vmem:[%s2390_s1 + $0x4e8] sm:$0xff]  ;;  %v1428_v51 = vpack.c.bf16 %v208_v40, %v207_v39 }
  0x48   :  { %1409 = vmatprep.subr.bf16.mxu1 %v1408_v47  ;;  %784 = vmatprep.mubr.f32.mxu1 %v336_v46  ;;  %v1396_v45 = vpack.c.bf16 %v176_v38, %v175_v37  ;;  %v160_v47 = vld [vmem:[%s2390_s1 + $0x468] sm:$0xff] }
  0x49   :  { %1379 = vmatpush3.bf16.msra.mxu0 %v1378_v56 }
  0x4a   :  { %1381 = vmatprep.subr.bf16.mxu0 %v1380_v57 }
  0x4b   :  { %1411 = vmatpush3.bf16.msra.mxu1 %v1410_v34 }
  0x4c   :  { %1413 = vmatprep.subr.bf16.mxu1 %v1412_v61 }
  0x4d   :  { %1383 = vmatpush3.bf16.msra.mxu0 %v1382_v3 }
  0x4e   :  { %1385 = vmatprep.subr.bf16.mxu0 %v1384_v5 }
  0x4f   :  { %1415 = vmatpush3.bf16.msra.mxu1 %v1414_v4 }
  0x50   :  { %1417 = vmatprep.subr.bf16.mxu1 %v1416_v9 }
  0x51   :  { %1387 = vmatpush3.bf16.msra.mxu0 %v1386_v16 }
  0x52   :  { %1389 = vmatprep.subr.bf16.mxu0 %v1388_v18 }
  0x53   :  { %1419 = vmatpush3.bf16.msra.mxu1 %v1418_v17 }
  0x54   :  { %1421 = vmatprep.subr.bf16.mxu1 %v1420_v22 }
  0x55   :  { %1391 = vmatpush3.bf16.msra.mxu0 %v1390_v28 }
  0x56   :  { %1393 = vmatprep.subr.bf16.mxu0 %v1392_v30 }
  0x57   :  { %1423 = vmatpush3.bf16.msra.mxu1 %v1422_v29 }
  0x58   :  { %1425 = vmatprep.subr.bf16.mxu1 %v1424_v35 }
  0x59   :  { %8 = vsyncpa [#allocation3], 0  ;;  %v209_v54 = vld [vmem:[%s2390_s1 + $0x5f0] sm:$0xff]  ;;  %v210_v56 = vld [vmem:[%s2390_s1 + $0x5f8] sm:$0xff]  ;;  %1395 = vmatpush3.bf16.msra.mxu0 %v1394_v41  ;;  %v1398_v34 = vpack.c.bf16 %v160_v47, %v159_v42  ;;  %v1430_v58 = vpack.c.bf16 %v192_v50, %v191_v48  ;;  %v1400_v59 = vpack.c.bf16 %v178_v53, %v177_v52  ;;  %vm946_vm7 = vcmask 443392  }
  0x5a   :  { %v18_v57 = vld [vmem:[%s2389_s0 + $0x18] sm:$0xff]  ;;  %1397 = vmatprep.subr.bf16.mxu0 %v1396_v45  ;;  %v161_v60 = vld [vmem:[%s2390_s1 + $0x470] sm:$0xff]  ;;  %v1432_v62 = vpack.c.bf16 %v210_v56, %v209_v54  ;;  %v227_v0 = vld [vmem:[%s2390_s1 + $0x680] sm:$0xff] }
  0x5b   :  { %1427 = vmatpush3.bf16.msra.mxu1 %v1426_v43  ;;  %v162_v46 = vld [vmem:[%s2390_s1 + $0x478] sm:$0xff]  ;;  %v193_v61 = vld [vmem:[%s2390_s1 + $0x570] sm:$0xff]  ;;  %v228_v1 = vld [vmem:[%s2390_s1 + $0x688] sm:$0xff]  ;;  %v337_v4 = vcombine.high %v18_v57, %v18_v57  ;;  %v2198_v16 = vrot.slane %v18_v57, %v1703_v13 }
  0x5c   :  { %1429 = vmatprep.subr.bf16.mxu1 %v1428_v51  ;;  %v194_v63 = vld [vmem:[%s2390_s1 + $0x578] sm:$0xff]  ;;  %v259_v2 = vld [vmem:[%s2390_s1 + $0x780] sm:$0xff]  ;;  %v260_v3 = vld [vmem:[%s2390_s1 + $0x788] sm:$0xff]  ;;  %v1402_v5 = vpack.c.bf16 %v162_v46, %v161_v60  ;;  %v1436_v7 = vpack.c.bf16 %v228_v1, %v227_v0 }
  0x5d   :  { %1399 = vmatpush3.bf16.msra.mxu0 %v1398_v34  ;;  %v1434_v6 = vpack.c.bf16 %v194_v63, %v193_v61  ;;  %v211_v8 = vld [vmem:[%s2390_s1 + $0x600] sm:$0xff]  ;;  %v212_v9 = vld [vmem:[%s2390_s1 + $0x608] sm:$0xff]  ;;  %v1468_v11 = vpack.c.bf16 %v260_v3, %v259_v2  ;;  %v229_v14 = vld [vmem:[%s2390_s1 + $0x690] sm:$0xff]  ;;  %v2207_v19 = vrot.slane %v337_v4, %v1703_v13  ;;  %v352_v29 = vcombine.high %v2198_v16, %v2198_v16 }
  0x5e   :  { %1401 = vmatprep.subr.bf16.mxu0 %v1400_v59  ;;  %v243_v10 = vld [vmem:[%s2390_s1 + $0x700] sm:$0xff]  ;;  %v244_v12 = vld [vmem:[%s2390_s1 + $0x708] sm:$0xff]  ;;  %v230_v15 = vld [vmem:[%s2390_s1 + $0x698] sm:$0xff]  ;;  %v1438_v20 = vpack.c.bf16 %v212_v9, %v211_v8 }
  0x5f   :  { %1431 = vmatpush3.bf16.msra.mxu1 %v1430_v58  ;;  %v261_v17 = vld [vmem:[%s2390_s1 + $0x790] sm:$0xff]  ;;  %v262_v18 = vld [vmem:[%s2390_s1 + $0x798] sm:$0xff]  ;;  %v1470_v21 = vpack.c.bf16 %v244_v12, %v243_v10  ;;  %v1440_v22 = vpack.c.bf16 %v230_v15, %v229_v14  ;;  %v231_v27 = vld [vmem:[%s2390_s1 + $0x6a0] sm:$0xff]  ;;  %v353_v32 = vcombine.high %v2207_v19, %v2207_v19 }
  0x60   :  { %1433 = vmatprep.subr.bf16.mxu1 %v1432_v62  ;;  %v213_v23 = vld [vmem:[%s2390_s1 + $0x610] sm:$0xff]  ;;  %v214_v24 = vld [vmem:[%s2390_s1 + $0x618] sm:$0xff]  ;;  %v1472_v13 = vpack.c.bf16 %v262_v18, %v261_v17  ;;  %v232_v28 = vld [vmem:[%s2390_s1 + $0x6a8] sm:$0xff] }
  0x61   :  { %1403 = vmatpush3.bf16.msra.mxu0 %v1402_v5  ;;  %v245_v25 = vld [vmem:[%s2390_s1 + $0x710] sm:$0xff]  ;;  %v246_v26 = vld [vmem:[%s2390_s1 + $0x718] sm:$0xff]  ;;  %v263_v30 = vld [vmem:[%s2390_s1 + $0x7a0] sm:$0xff]  ;;  %v1442_v33 = vpack.c.bf16 %v214_v24, %v213_v23  ;;  %v1444_v36 = vpack.c.bf16 %v232_v28, %v231_v27 }
  0x62   :  { %1437 = vmatprep.subr.bf16.mxu0 %v1436_v7  ;;  %v264_v31 = vld [vmem:[%s2390_s1 + $0x7a8] sm:$0xff]  ;;  %v1474_v35 = vpack.c.bf16 %v246_v26, %v245_v25  ;;  %v247_v38 = vld [vmem:[%s2390_s1 + $0x720] sm:$0xff]  ;;  %v233_v40 = vld [vmem:[%s2390_s1 + $0x6b0] sm:$0xff] }
  0x63   :  { %1435 = vmatpush3.bf16.msra.mxu1 %v1434_v6  ;;  %v216_v37 = vld [vmem:[%s2390_s1 + $0x628] sm:$0xff]  ;;  %v1476_v39 = vpack.c.bf16 %v264_v31, %v263_v30  ;;  %v234_v41 = vld [vmem:[%s2390_s1 + $0x6b8] sm:$0xff]  ;;  %v265_v42 = vld [vmem:[%s2390_s1 + $0x7b0] sm:$0xff] }
  0x64   :  { %1469 = vmatprep.subr.bf16.mxu1 %v1468_v11  ;;  %715 = vmatmul.mubr.f32.vlgmr.msra.gmra.mrb[4].mxu0 %v2006_v44  ;;  %v215_v44 = vld [vmem:[%s2390_s1 + $0x620] sm:$0xff]  ;;  %v266_v43 = vld [vmem:[%s2390_s1 + $0x7b8] sm:$0xff]  ;;  %v1448_v48 = vpack.c.bf16 %v234_v41, %v233_v40  ;;  %v217_v50 = vld [vmem:[%s2390_s1 + $0x630] sm:$0xff] }
  0x65   :  { %1439 = vmatpush3.bf16.msra.mxu0 %v1438_v20  ;;  %854 = vmatprep.mubr.f32.mxu0 %v352_v29  ;;  %v1446_v45 = vpack.c.bf16 %v216_v37, %v215_v44  ;;  %v218_v51 = vld [vmem:[%s2390_s1 + $0x638] sm:$0xff]  ;;  %v249_v52 = vld [vmem:[%s2390_s1 + $0x730] sm:$0xff]  ;;  %v1480_v53 = vpack.c.bf16 %v266_v43, %v265_v42  ;;  %v235_v56 = vld [vmem:[%s2390_s1 + $0x6c0] sm:$0xff] }
  0x66   :  { %785 = vmatmul.mubr.f32.vlgmr.msra.gmra.mrb[4].mxu1 %v2027_v55  ;;  %1441 = vmatprep.subr.bf16.mxu0 %v1440_v22  ;;  %v248_v55 = vld [vmem:[%s2390_s1 + $0x728] sm:$0xff]  ;;  %v250_v54 = vld [vmem:[%s2390_s1 + $0x738] sm:$0xff]  ;;  %v267_v57 = vld [vmem:[%s2390_s1 + $0x7c0] sm:$0xff]  ;;  %v1450_v59 = vpack.c.bf16 %v218_v51, %v217_v50 }
  0x67   :  { %1471 = vmatpush3.bf16.msra.mxu1 %v1470_v21  ;;  %924 = vmatprep.mubr.f32.mxu1 %v353_v32  ;;  %v1478_v47 = vpack.c.bf16 %v248_v55, %v247_v38  ;;  %v236_v34 = vld [vmem:[%s2390_s1 + $0x6c8] sm:$0xff]  ;;  %v1482_v60 = vpack.c.bf16 %v250_v54, %v249_v52  ;;  %v219_v61 = vld [vmem:[%s2390_s1 + $0x640] sm:$0xff]  ;;  %v237_v2 = vld [vmem:[%s2390_s1 + $0x6d0] sm:$0xff] }
  0x68   :  { %1473 = vmatprep.subr.bf16.mxu1 %v1472_v13  ;;  %v268_v58 = vld [vmem:[%s2390_s1 + $0x7c8] sm:$0xff]  ;;  %v1452_v46 = vpack.c.bf16 %v236_v34, %v235_v56  ;;  %v251_v63 = vld [vmem:[%s2390_s1 + $0x740] sm:$0xff]  ;;  %v238_v3 = vld [vmem:[%s2390_s1 + $0x6d8] sm:$0xff] }
  0x69   :  { %1443 = vmatpush3.bf16.msra.mxu0 %v1442_v33  ;;  %v220_v62 = vld [vmem:[%s2390_s1 + $0x648] sm:$0xff]  ;;  %v1484_v0 = vpack.c.bf16 %v268_v58, %v267_v57  ;;  %v269_v4 = vld [vmem:[%s2390_s1 + $0x7d0] sm:$0xff]  ;;  %v270_v5 = vld [vmem:[%s2390_s1 + $0x7d8] sm:$0xff]  ;;  %v1456_v8 = vpack.c.bf16 %v238_v3, %v237_v2 }
  0x6a   :  { %1445 = vmatprep.subr.bf16.mxu0 %v1444_v36  ;;  %v252_v1 = vld [vmem:[%s2390_s1 + $0x748] sm:$0xff]  ;;  %v1454_v6 = vpack.c.bf16 %v220_v62, %v219_v61  ;;  %v221_v9 = vld [vmem:[%s2390_s1 + $0x650] sm:$0xff]  ;;  %v222_v10 = vld [vmem:[%s2390_s1 + $0x658] sm:$0xff]  ;;  %v1488_v12 = vpack.c.bf16 %v270_v5, %v269_v4 }
  0x6b   :  { %1475 = vmatpush3.bf16.msra.mxu1 %v1474_v35  ;;  %v1486_v7 = vpack.c.bf16 %v252_v1, %v251_v63  ;;  %v253_v11 = vld [vmem:[%s2390_s1 + $0x750] sm:$0xff]  ;;  %v254_v14 = vld [vmem:[%s2390_s1 + $0x758] sm:$0xff]  ;;  %v239_v15 = vld [vmem:[%s2390_s1 + $0x6e0] sm:$0xff]  ;;  %v1458_v21 = vpack.c.bf16 %v222_v10, %v221_v9 }
  0x6c   :  { %1477 = vmatprep.subr.bf16.mxu1 %v1476_v39  ;;  %v240_v17 = vld [vmem:[%s2390_s1 + $0x6e8] sm:$0xff]  ;;  %v271_v18 = vld [vmem:[%s2390_s1 + $0x7e0] sm:$0xff]  ;;  %v1490_v22 = vpack.c.bf16 %v254_v14, %v253_v11  ;;  %v241_v28 = vld [vmem:[%s2390_s1 + $0x6f0] sm:$0xff] }
  0x6d   :  { %1447 = vmatpush3.bf16.msra.mxu0 %v1446_v45  ;;  %v272_v20 = vld [vmem:[%s2390_s1 + $0x7e8] sm:$0xff]  ;;  %v1460_v23 = vpack.c.bf16 %v240_v17, %v239_v15  ;;  %v223_v24 = vld [vmem:[%s2390_s1 + $0x660] sm:$0xff]  ;;  %v242_v29 = vld [vmem:[%s2390_s1 + $0x6f8] sm:$0xff] }
  0x6e   :  { %1449 = vmatprep.subr.bf16.mxu0 %v1448_v48  ;;  %v224_v25 = vld [vmem:[%s2390_s1 + $0x668] sm:$0xff]  ;;  %v255_v13 = vld [vmem:[%s2390_s1 + $0x760] sm:$0xff]  ;;  %v1492_v26 = vpack.c.bf16 %v272_v20, %v271_v18  ;;  %v273_v30 = vld [vmem:[%s2390_s1 + $0x7f0] sm:$0xff]  ;;  %v1464_v35 = vpack.c.bf16 %v242_v29, %v241_v28 }
  0x6f   :  { %1479 = vmatpush3.bf16.msra.mxu1 %v1478_v47  ;;  %v256_v27 = vld [vmem:[%s2390_s1 + $0x768] sm:$0xff]  ;;  %v274_v31 = vld [vmem:[%s2390_s1 + $0x7f8] sm:$0xff]  ;;  %v1462_v32 = vpack.c.bf16 %v224_v25, %v223_v24  ;;  %v225_v36 = vld [vmem:[%s2390_s1 + $0x670] sm:$0xff] }
  0x70   :  { %1481 = vmatprep.subr.bf16.mxu1 %v1480_v53  ;;  %v1494_v33 = vpack.c.bf16 %v256_v27, %v255_v13  ;;  %v226_v44 = vld [vmem:[%s2390_s1 + $0x678] sm:$0xff]  ;;  %v1496_v37 = vpack.c.bf16 %v274_v31, %v273_v30  ;;  %v257_v38 = vld [vmem:[%s2390_s1 + $0x770] sm:$0xff]  ;;  %v962_v42 = vld [vmem:[%s2391_s2] ss:$0 sm:$0xff] }
  0x71   :  { %1451 = vmatpush3.bf16.msra.mxu0 %v1450_v59  ;;  %v258_v39 = vld [vmem:[%s2390_s1 + $0x778] sm:$0xff]  ;;  %v1466_v55 = vpack.c.bf16 %v226_v44, %v225_v36  ;;  %s1531_s1 = smov [#allocation2]  }
  0x72   :  { %1453 = vmatprep.subr.bf16.mxu0 %v1452_v46  ;;  %v1498_v40 = vpack.c.bf16 %v258_v39, %v257_v38  ;;  %s954_s2 = sshll.u32 %s1531_s1, 4  ;;  %s955_s2 = int_to_ptr.vmem [resolvable:$true] %s954_s2 }
  0x73   :  { %1483 = vmatpush3.bf16.msra.mxu1 %v1482_v60  ;;  %s1506_s16 = scalar_lea.vmem %s955_s2, 32  ;;  %p1511_p1 = scmp.lt.s32.totalorder %s955_s2, %s955_s2 }
  0x74   :  { %1485 = vmatprep.subr.bf16.mxu1 %v1484_v0  ;;  %p1507_p0 = scmp.ne.s32.totalorder %s955_s2, %s1506_s16  ;;  %p1512_p2 = scmp.lt.s32.totalorder %s1506_s16, %s1506_s16 }
  0x75   :  { %1455 = vmatpush3.bf16.msra.mxu0 %v1454_v6 }
  0x76   :  { %1457 = vmatprep.subr.bf16.mxu0 %v1456_v8  ;;  %p1513_p3 = por %p1512_p2, %p1511_p1 }
  0x77   :  { %1487 = vmatpush3.bf16.msra.mxu1 %v1486_v7  ;;  %v931_v7 = vand.u32 127, %v290_v49 }
  0x78   :  { %1489 = vmatprep.subr.bf16.mxu1 %v1488_v12  ;;  %p1514_p4 = pnand %p1513_p3, %p1507_p0 }
  0x79   :  { %1459 = vmatpush3.bf16.msra.mxu0 %v1458_v21  ;;  %vm936_vm0 = vcmp.ge.s32.totalorder %v931_v7, 50  ;;  %vm937_vm1 = vcmp.lt.s32.totalorder %v931_v7, 52  ;;  %vm942_vm2 = vcmp.ge.s32.totalorder %v931_v7, 53  ;;  %vm943_vm3 = vcmp.lt.s32.totalorder %v931_v7, 55 }
  0x7a   :  { %1461 = vmatprep.subr.bf16.mxu0 %v1460_v23  ;;  %vm938_vm4 = vmand %vm936_vm0, %vm937_vm1  ;;  %vm940_vm5 = vcmp.eq.s32.totalorder %v931_v7, 52 }
  0x7b   :  { %1491 = vmatpush3.bf16.msra.mxu1 %v1490_v22  ;;  %vm944_vm6 = vmand %vm942_vm2, %vm943_vm3 }
  0x7c   :  { %1493 = vmatprep.subr.bf16.mxu1 %v1492_v26 }
  0x7d   :  { %1463 = vmatpush3.bf16.msra.mxu0 %v1462_v32 }
  0x7e   :  { %1465 = vmatprep.subr.bf16.mxu0 %v1464_v35 }
  0x7f   :  { %1495 = vmatpush3.bf16.msra.mxu1 %v1494_v33 }
  0x80   :  { %1497 = vmatprep.subr.bf16.mxu1 %v1496_v37 }
  0x81   :  { %1467 = vmatpush3.bf16.msra.mxu0 %v1466_v55 }
  0x83   :  { %1499 = vmatpush3.bf16.msra.mxu1 %v1498_v40 }
  0x84   :  { %855 = vmatmul.mubr.f32.vlgmr.msra.gmra.mrb[6].mxu0 %v2198_v16 }
  0x86   :  { %925 = vmatmul.mubr.f32.vlgmr.msra.gmra.mrb[6].mxu1 %v2207_v19 }
  0xf7   :  { %v996_v41 = vpop.f32.mrb[0].mxu0 }
  0xf8   :  { %v997_v43 = vpop.f32.mrb[1].mxu0 }
  0xf9   :  { %v1031_v45 = vpop.f32.mrb[0].mxu1  ;;  %v998_v47 = vadd.f32 %v997_v43, %v996_v41 }
  0xfa   :  { %v1032_v48 = vpop.f32.mrb[1].mxu1 }
  0xfb   :  { %v1033_v50 = vadd.f32 %v1032_v48, %v1031_v45  ;;  %v437_v51 = vadd.f32 %v998_v47, %v962_v42 }
  0xfd   :  { %v507_v52 = vadd.f32 %v1033_v50, %v437_v51 }
 0x117   :  { %v1066_v53 = vpop.f32.mrb[2].mxu0 }
 0x118   :  { %v1067_v54 = vpop.f32.mrb[3].mxu0 }
 0x119   :  { %v1101_v56 = vpop.f32.mrb[2].mxu1  ;;  %v1068_v34 = vadd.f32 %v1067_v54, %v1066_v53 }
 0x11a   :  { %v1102_v57 = vpop.f32.mrb[3].mxu1 }
 0x11b   :  { %v1103_v16 = vadd.f32 %v1102_v57, %v1101_v56  ;;  %v577_v58 = vadd.f32 %v1068_v34, %v507_v52 }
 0x11d   :  { %v647_v19 = vadd.f32 %v1103_v16, %v577_v58 }
 0x137   :  { %v1136_v59 = vpop.f32.mrb[4].mxu0 }
 0x138   :  { %v1137_v60 = vpop.f32.mrb[5].mxu0 }
 0x139   :  { %v1171_v46 = vpop.f32.mrb[4].mxu1  ;;  %v1138_v61 = vadd.f32 %v1137_v60, %v1136_v59 }
 0x13a   :  { %v1172_v62 = vpop.f32.mrb[5].mxu1 }
 0x13b   :  { %v1173_v63 = vadd.f32 %v1172_v62, %v1171_v46  ;;  %v717_v0 = vadd.f32 %v1138_v61, %v647_v19 }
 0x13d   :  { %v787_v1 = vadd.f32 %v1173_v63, %v717_v0 }
 0x157   :  { %v1206_v2 = vpop.f32.mrb[6].mxu0 }
 0x158   :  { %v1207_v3 = vpop.f32.mrb[7].mxu0 }
 0x159   :  { %v1241_v4 = vpop.f32.mrb[6].mxu1  ;;  %v1208_v5 = vadd.f32 %v1207_v3, %v1206_v2 }
 0x15a   :  { %v1242_v6 = vpop.f32.mrb[7].mxu1 }
 0x15b   :  { %v1243_v8 = vadd.f32 %v1242_v6, %v1241_v4  ;;  %v857_v9 = vadd.f32 %v1208_v5, %v787_v1 }
 0x15d   :  { %v927_v10 = vadd.f32 %v1243_v8, %v857_v9 }
 0x15f   :  { %v932_v11 = vmax.f32 %v927_v10, 0.0  ;;  %v963_v14 = vclamps-f32 %v927_v10, 0.2 }
 0x161   :  { %v933_v12 = vmin.f32 %v932_v11, 1.0 }
 0x163   :  { %v939_v15 = vsel %vm938_vm4, %v933_v12, %v927_v10 }
 0x164   :  { %v941_v17 = vsel %vm940_vm5, %v932_v11, %v939_v15 }
 0x165   :  { %v945_v49 = vsel %vm944_vm6, %v963_v14, %v941_v17 }
 0x166   :  { %947 = vst.msk [vmem:[#allocation2] sm:$0x3] %vm946_vm7, %v945_v49 }
 0x167   :  { %1517 = shalt.err (!%p1514_p4)
}
 0x168   :  { %s1518_s19 = scalar_lea.hbm %s2392_s3, 32 }
 0x169   :  { %p1519_p5 = scmp.ne.s32.totalorder %s2392_s3, %s1518_s19  ;;  %p1522_p6 = scmp.lt.u32.totalorder %s1518_s19, %s2392_s3 }
 0x16b   :  { %p1524_p7 = pnand %p1522_p6, %p1519_p5 }
 0x16d   :  { %1527 = shalt.err (!%p1524_p7)
}
 0x16e   :  { %957 = dma.vmem_to_hbm [thread:$0]  %s955_s2, 32, %s2392_s3, [#allocation3]  }
 0x16f   :  { %1528 = dma.done.wait [#allocation3], 32  }
 0x170   :  { %1529 = vsyncadd [#allocation3], 4294967264 }
 0x171   :  { %961 = vsyncpa [#allocation3], 1 }

</bundles_post_ra>
